<compile_context>
chip_gen: v5e
topology: v5e:2x2
jax: 0.10.0
libtpu: 0.0.40
codegen_flags: <defaults>
</compile_context>

<pallas_src>
import functools

import numpy as np
import jax
import jax.numpy as jnp
from jax import lax
from jax.experimental import pallas as pl
from jax.experimental.pallas import tpu as pltpu

_BN_EPS = 1e-5


# ----------------------------- Pallas kernel ------------------------------ #

def _deconv_bn_prelu_kernel(alpha_ref, slab_ref, w_ref, scale_ref, shift_ref,
                            o_ref):
    """One padded-input row slab -> one (TR*W, 4*Cout) phase-packed output block.

    slab_ref : (TR+2, W+2, Cin)  bf16  padded-input rows with 2-row halo
    w_ref    : (9*Cin, 4*Cout)   bf16  phase-combined transposed-conv weights
    scale_ref: (1, 4*Cout)       f32   folded BatchNorm scale (tiled over phases)
    shift_ref: (1, 4*Cout)       f32   folded conv-bias + BN shift
    alpha_ref: (1,)              f32   PReLU slope (SMEM)
    o_ref    : (TR*W, 4*Cout)    f32
    """
    tr2, wp, c_in = slab_ref.shape
    tr, w_dim = tr2 - 2, wp - 2

    slab = slab_ref[...]
    # In-kernel im2col: 9 statically shifted (TR, W, Cin) views of the slab,
    # concatenated along the K (lane) dim -> (TR*W, 9*Cin) patch matrix in VMEM.
    taps = [slab[dy:dy + tr, dx:dx + w_dim, :].reshape(tr * w_dim, c_in)
            for dy in range(3) for dx in range(3)]
    patches = jnp.concatenate(taps, axis=-1)                     # (TR*W, 9*Cin)

    acc = jnp.dot(patches, w_ref[...], preferred_element_type=jnp.float32)
    y = acc * scale_ref[...] + shift_ref[...]                    # f32 epilogue
    alpha = alpha_ref[0]
    o_ref[...] = jnp.where(y > 0.0, y, alpha * y)


def _pick_row_tile(batch, height, width, target_rows=2048, min_steps=4):
    """Input rows per grid step: large enough to amortize the ~0.35us per-step
    overhead (~target_rows patch rows), small enough to keep >= min_steps grid
    steps (v7x: 2 TCs x double-buffering), and an exact divisor of H so no pad /
    ragged-tail handling is needed."""
    cap = max(1, min(height, target_rows // max(width, 1)))

    def steps(t):
        return batch * ((height + t - 1) // t)

    while cap > 1 and steps(cap) < min_steps:
        cap = max(1, cap // 2)
    for tr in range(cap, 0, -1):
        if height % tr == 0:
            return tr
    return 1


def fused_deconv_bn_prelu(slabs, w_mat, scale, shift, alpha):
    """slabs: (B*NR, TR+2, W+2, Cin) bf16 -> (B*NR, TR*W, 4*Cout) f32."""
    n_slabs, tr2, wp, c_in = slabs.shape
    tr, w_dim = tr2 - 2, wp - 2
    n = w_mat.shape[1]
    tile_m = tr * w_dim

    cost = pl.CostEstimate(
        flops=2 * n_slabs * tile_m * (9 * c_in) * n,
        transcendentals=0,
        bytes_accessed=(slabs.size * slabs.dtype.itemsize
                        + w_mat.size * w_mat.dtype.itemsize
                        + (scale.size + shift.size) * 4
                        + n_slabs * tile_m * n * 4),
    )

    return pl.pallas_call(
        _deconv_bn_prelu_kernel,
        out_shape=jax.ShapeDtypeStruct((n_slabs, tile_m, n), jnp.float32),
        grid=(n_slabs,),
        in_specs=[
            # scalar PReLU alpha lives in SMEM (no per-tile vector DMA)
            pl.BlockSpec(memory_space=pltpu.MemorySpace.SMEM),
            # input row slab (with halo) streams through VMEM, auto double-buffered
            pl.BlockSpec((None, tr2, wp, c_in), lambda i: (i, 0, 0, 0)),
            # weights / scale / shift: constant index_map -> fetched once
            pl.BlockSpec((9 * c_in, n), lambda i: (0, 0)),
            pl.BlockSpec((1, n), lambda i: (0, 0)),
            pl.BlockSpec((1, n), lambda i: (0, 0)),
        ],
        out_specs=pl.BlockSpec((None, tile_m, n), lambda i: (i, 0, 0)),
        compiler_params=pltpu.CompilerParams(
            dimension_semantics=("parallel",),
            vmem_limit_bytes=32 * 1024 * 1024,   # safe on v5e/v6e (128 MiB) & v7x (64 MiB)
        ),
        cost_estimate=cost,
    )(alpha, slabs, w_mat, scale, shift)


# ------------------------------- JAX glue ---------------------------------- #

def _phase_weights(w):
    """ConvTranspose2d weight (Cin, Cout, 4, 4) -> (9*Cin, 4*Cout) matrix.

    K layout: (dy, dx, cin); N layout: (py, px, cout).  Output pixel (2m+py, 2n+px)
    only depends on a 2x2 input neighbourhood; tap (dy, dx) of the 3x3 window maps
    to kernel index (ky, kx) = (3 - 2*dy + py, 3 - 2*dx + px) when valid.
    """
    cin, cout = w.shape[0], w.shape[1]
    wb = jnp.zeros((3, 3, cin, 2, 2, cout), jnp.float32)
    for dy in range(3):
        for dx in range(3):
            for py in range(2):
                for px in range(2):
                    ky = 3 - 2 * dy + py
                    kx = 3 - 2 * dx + px
                    if 0 <= ky <= 3 and 0 <= kx <= 3:
                        wb = wb.at[dy, dx, :, py, px, :].set(w[:, :, ky, kx])
    return wb.reshape(9 * cin, 4 * cout)


def deconv_block2_forward(x, params, *, target_rows=2048):
    """x: (B, Cin, H, W) NCHW f32 -> (B, Cout, 2H, 2W) NCHW f32."""
    w, b, gamma, beta, mu, var, alpha = params
    c_in, c_out = w.shape[0], w.shape[1]
    B, _, H, W = x.shape

    # bf16 BEFORE any layout work: halves wrapper-side HBM traffic.
    x_nhwc = jnp.transpose(x.astype(jnp.bfloat16), (0, 2, 3, 1))   # (B, H, W, Cin)
    xpad = jnp.pad(x_nhwc, ((0, 0), (1, 1), (1, 1), (0, 0)))       # (B, H+2, W+2, Cin)

    tr = _pick_row_tile(B, H, W, target_rows=target_rows)
    nr = H // tr
    # Row slabs with a 2-row halo: the only wrapper-side gather, ~(1 + 2/tr) x the
    # bf16 input bytes (vs. the 9x materialized im2col this replaces).
    slabs = jnp.stack([xpad[:, r * tr: r * tr + tr + 2] for r in range(nr)], axis=1)
    slabs = slabs.reshape(B * nr, tr + 2, W + 2, c_in)

    w_mat = _phase_weights(w).astype(jnp.bfloat16)                 # (9*Cin, 4*Cout)

    # Fold conv bias + eval-mode BatchNorm into per-channel scale/shift; replicate
    # across the 4 parity phases to match the N = (py, px, cout) layout.
    scale_c = gamma / jnp.sqrt(var + _BN_EPS)
    shift_c = beta + (b - mu) * scale_c
    scale = jnp.tile(scale_c, 4)[None, :].astype(jnp.float32)
    shift = jnp.tile(shift_c, 4)[None, :].astype(jnp.float32)

    out = fused_deconv_bn_prelu(
        slabs, w_mat, scale, shift,
        jnp.asarray(alpha, jnp.float32).reshape(1))                # (B*nr, tr*W, 4*Cout)

    # Single output transpose: (B,H,W,py,px,C) -> (B,C,H,py,W,px) -> (B,C,2H,2W).
    y = out.reshape(B, H, W, 2, 2, c_out)
    y = jnp.transpose(y, (0, 5, 1, 3, 2, 4)).reshape(B, c_out, 2 * H, 2 * W)
    return y


# ------------------------- pure-JAX reference ------------------------------ #

def deconv_block2_reference(x, params):
    """ConvTranspose2d + BN(eval) + PReLU via lax.conv (bf16-quantized operands)."""
    w, b, gamma, beta, mu, var, alpha = params
    xq = x.astype(jnp.bfloat16).astype(jnp.float32)
    wq = w.astype(jnp.bfloat16).astype(jnp.float32)
    w_conv = jnp.transpose(wq, (1, 0, 2, 3))[:, :, ::-1, ::-1]     # (Cout, Cin, 4, 4)
    y = lax.conv_general_dilated(
        xq, w_conv, window_strides=(1, 1), padding=((2, 2), (2, 2)),
        lhs_dilation=(2, 2), dimension_numbers=("NCHW", "OIHW", "NCHW"),
        precision=lax.Precision.HIGHEST)
    y = y + b[None, :, None, None]
    scale = gamma / jnp.sqrt(var + _BN_EPS)
    y = (y - mu[None, :, None, None]) * scale[None, :, None, None] \
        + beta[None, :, None, None]
    return jnp.where(y > 0, y, alpha * y)


# --------------------------- deterministic init ----------------------------- #

def init_deconv_block2(key, c_in, c_out, k=4):
    kw, kb = jax.random.split(key, 2)
    bound = 1.0 / np.sqrt(c_in * k * k)
    w = jax.random.uniform(kw, (c_in, c_out, k, k), jnp.float32, -bound, bound)
    b = jax.random.uniform(kb, (c_out,), jnp.float32, -bound, bound)
    gamma = jnp.ones((c_out,), jnp.float32)
    beta = jnp.zeros((c_out,), jnp.float32)
    mu = jnp.zeros((c_out,), jnp.float32)
    var = jnp.ones((c_out,), jnp.float32)
    alpha = jnp.float32(0.25)                            # nn.PReLU() default
    return (w, b, gamma, beta, mu, var, alpha)


# ---------------------------------- main ------------------------------------ #

if __name__ == "__main__":
    batch, c_in, c_out, hw = 2, 32, 32, 16

    key = jax.random.PRNGKey(0)
    k_params, k_x = jax.random.split(key)
    params = init_deconv_block2(k_params, c_in, c_out)
    x = jax.random.normal(k_x, (batch, c_in, hw, hw), jnp.float32)

    fwd = jax.jit(functools.partial(deconv_block2_forward, target_rows=2048))
    out = jax.block_until_ready(fwd(x, params))

    assert out.shape == (batch, c_out, 2 * hw, 2 * hw), out.shape
    assert bool(jnp.all(jnp.isfinite(out)))

    ref = jax.block_until_ready(deconv_block2_reference(x, params))
    max_err = float(jnp.max(jnp.abs(out - ref)))
    assert bool(jnp.allclose(out, ref, atol=2e-3, rtol=2e-3)), max_err

    print("KERNEL_OK")
</pallas_src>

<mosaic_0001>
module attributes {stable_mosaic.version = 11 : i64} {
  func.func @_deconv_bn_prelu_kernel(%arg0: i32, %arg1: memref<1xf32, #tpu.memory_space<smem>>, %arg2: memref<1x10x18x32xbf16, #tpu.memory_space<vmem>>, %arg3: memref<288x128xbf16, #tpu.memory_space<vmem>>, %arg4: memref<1x128xf32, #tpu.memory_space<vmem>>, %arg5: memref<1x128xf32, #tpu.memory_space<vmem>>, %arg6: memref<1x128x128xf32, #tpu.memory_space<vmem>>) attributes {dimension_semantics = [#tpu.dimension_semantics<parallel>], iteration_bounds = array<i64: 4>, scalar_prefetch = 0 : i64, scratch_operands = 0 : i64, tpu.core_type = #tpu.core_type<tc>, window_params = [{transform_indices = @transform_0, window_bounds = array<i64: 1>}, {transform_indices = @transform_1, window_bounds = array<i64: 1, 10, 18, 32>}, {pipeline_mode = #tpu.pipeline_mode<synchronous>, transform_indices = @transform_2, window_bounds = array<i64: 288, 128>}, {pipeline_mode = #tpu.pipeline_mode<synchronous>, transform_indices = @transform_3, window_bounds = array<i64: 1, 128>}, {pipeline_mode = #tpu.pipeline_mode<synchronous>, transform_indices = @transform_4, window_bounds = array<i64: 1, 128>}, {transform_indices = @transform_5, window_bounds = array<i64: 1, 128, 128>}]} {
    %c0 = arith.constant 0 : index
    %c0_0 = arith.constant 0 : index
    %c0_1 = arith.constant 0 : index
    %c0_2 = arith.constant 0 : index
    %0 = vector.load %arg2[%c0, %c0_0, %c0_1, %c0_2] : memref<1x10x18x32xbf16, #tpu.memory_space<vmem>>, vector<1x10x18x32xbf16>
    %1 = vector.shape_cast %0 : vector<1x10x18x32xbf16> to vector<10x18x32xbf16>
    %2 = vector.extract_strided_slice %1 {offsets = [0, 0, 0], sizes = [8, 16, 32], strides = [1, 1, 1]} : vector<10x18x32xbf16> to vector<8x16x32xbf16>
    %3 = vector.shape_cast %2 : vector<8x16x32xbf16> to vector<128x32xbf16>
    %4 = vector.extract_strided_slice %1 {offsets = [0, 1, 0], sizes = [8, 16, 32], strides = [1, 1, 1]} : vector<10x18x32xbf16> to vector<8x16x32xbf16>
    %5 = vector.shape_cast %4 : vector<8x16x32xbf16> to vector<128x32xbf16>
    %6 = vector.extract_strided_slice %1 {offsets = [0, 2, 0], sizes = [8, 16, 32], strides = [1, 1, 1]} : vector<10x18x32xbf16> to vector<8x16x32xbf16>
    %7 = vector.shape_cast %6 : vector<8x16x32xbf16> to vector<128x32xbf16>
    %8 = vector.extract_strided_slice %1 {offsets = [1, 0, 0], sizes = [8, 16, 32], strides = [1, 1, 1]} : vector<10x18x32xbf16> to vector<8x16x32xbf16>
    %9 = vector.shape_cast %8 : vector<8x16x32xbf16> to vector<128x32xbf16>
    %10 = vector.extract_strided_slice %1 {offsets = [1, 1, 0], sizes = [8, 16, 32], strides = [1, 1, 1]} : vector<10x18x32xbf16> to vector<8x16x32xbf16>
    %11 = vector.shape_cast %10 : vector<8x16x32xbf16> to vector<128x32xbf16>
    %12 = vector.extract_strided_slice %1 {offsets = [1, 2, 0], sizes = [8, 16, 32], strides = [1, 1, 1]} : vector<10x18x32xbf16> to vector<8x16x32xbf16>
    %13 = vector.shape_cast %12 : vector<8x16x32xbf16> to vector<128x32xbf16>
    %14 = vector.extract_strided_slice %1 {offsets = [2, 0, 0], sizes = [8, 16, 32], strides = [1, 1, 1]} : vector<10x18x32xbf16> to vector<8x16x32xbf16>
    %15 = vector.shape_cast %14 : vector<8x16x32xbf16> to vector<128x32xbf16>
    %16 = vector.extract_strided_slice %1 {offsets = [2, 1, 0], sizes = [8, 16, 32], strides = [1, 1, 1]} : vector<10x18x32xbf16> to vector<8x16x32xbf16>
    %17 = vector.shape_cast %16 : vector<8x16x32xbf16> to vector<128x32xbf16>
    %18 = vector.extract_strided_slice %1 {offsets = [2, 2, 0], sizes = [8, 16, 32], strides = [1, 1, 1]} : vector<10x18x32xbf16> to vector<8x16x32xbf16>
    %19 = vector.shape_cast %18 : vector<8x16x32xbf16> to vector<128x32xbf16>
    %20 = tpu.concatenate %3, %5, %7, %9, %11, %13, %15, %17, %19 in 1 : vector<128x32xbf16>, vector<128x32xbf16>, vector<128x32xbf16>, vector<128x32xbf16>, vector<128x32xbf16>, vector<128x32xbf16>, vector<128x32xbf16>, vector<128x32xbf16>, vector<128x32xbf16> -> vector<128x288xbf16>
    %c0_3 = arith.constant 0 : index
    %c0_4 = arith.constant 0 : index
    %21 = vector.load %arg3[%c0_3, %c0_4] : memref<288x128xbf16, #tpu.memory_space<vmem>>, vector<288x128xbf16>
    %cst = arith.constant dense<0.000000e+00> : vector<128x128xf32>
    %22 = tpu.matmul %20, %21, %cst {dimension_numbers = #tpu.dot_dimension_numbers<[1], [0], [0], [1], [0, 0, 1, 1], [], []>} : vector<128x288xbf16>, vector<288x128xbf16>, vector<128x128xf32> -> vector<128x128xf32>
    %c0_5 = arith.constant 0 : index
    %c0_6 = arith.constant 0 : index
    %23 = vector.load %arg4[%c0_5, %c0_6] : memref<1x128xf32, #tpu.memory_space<vmem>>, vector<1x128xf32>
    %24 = vector.broadcast %23 : vector<1x128xf32> to vector<128x128xf32>
    %25 = arith.mulf %22, %24 : vector<128x128xf32>
    %c0_7 = arith.constant 0 : index
    %c0_8 = arith.constant 0 : index
    %26 = vector.load %arg5[%c0_7, %c0_8] : memref<1x128xf32, #tpu.memory_space<vmem>>, vector<1x128xf32>
    %27 = vector.broadcast %26 : vector<1x128xf32> to vector<128x128xf32>
    %28 = arith.addf %25, %27 : vector<128x128xf32>
    %c0_9 = arith.constant 0 : index
    %29 = memref.load %arg1[%c0_9] : memref<1xf32, #tpu.memory_space<smem>>
    %cst_10 = arith.constant 0.000000e+00 : f32
    %30 = vector.broadcast %cst_10 : f32 to vector<128x128xf32>
    %31 = arith.cmpf ogt, %28, %30 : vector<128x128xf32>
    %32 = vector.broadcast %29 : f32 to vector<128x128xf32>
    %33 = arith.mulf %32, %28 : vector<128x128xf32>
    %34 = arith.select %31, %28, %33 : vector<128x128xi1>, vector<128x128xf32>
    %c0_11 = arith.constant 0 : index
    %c0_12 = arith.constant 0 : index
    %c0_13 = arith.constant 0 : index
    %35 = vector.load %arg6[%c0_11, %c0_12, %c0_13] : memref<1x128x128xf32, #tpu.memory_space<vmem>>, vector<1x128x128xf32>
    %36 = vector.shape_cast %35 : vector<1x128x128xf32> to vector<128x128xf32>
    %37 = vector.shape_cast %34 : vector<128x128xf32> to vector<1x128x128xf32>
    tpu.vector_store %arg6[%c0_11, %c0_12, %c0_13], %37 {strides = array<i32>} : memref<1x128x128xf32, #tpu.memory_space<vmem>>, vector<1x128x128xf32>,
    return
  }
  func.func @transform_0(%arg0: i32) -> i32 {
    %c0_i32 = arith.constant 0 : i32
    %c0_i32_0 = arith.constant 0 : i32
    return %c0_i32 : i32
  }
  func.func @transform_1(%arg0: i32) -> (i32, i32, i32, i32) {
    %c0_i32 = arith.constant 0 : i32
    %c0_i32_0 = arith.constant 0 : i32
    %c0_i32_1 = arith.constant 0 : i32
    %c0_i32_2 = arith.constant 0 : i32
    return %arg0, %c0_i32, %c0_i32_0, %c0_i32_1 : i32, i32, i32, i32
  }
  func.func @transform_2(%arg0: i32) -> (i32, i32) {
    %c0_i32 = arith.constant 0 : i32
    %c0_i32_0 = arith.constant 0 : i32
    %c0_i32_1 = arith.constant 0 : i32
    return %c0_i32, %c0_i32_0 : i32, i32
  }
  func.func @transform_3(%arg0: i32) -> (i32, i32) {
    %c0_i32 = arith.constant 0 : i32
    %c0_i32_0 = arith.constant 0 : i32
    %c0_i32_1 = arith.constant 0 : i32
    return %c0_i32, %c0_i32_0 : i32, i32
  }
  func.func @transform_4(%arg0: i32) -> (i32, i32) {
    %c0_i32 = arith.constant 0 : i32
    %c0_i32_0 = arith.constant 0 : i32
    %c0_i32_1 = arith.constant 0 : i32
    return %c0_i32, %c0_i32_0 : i32, i32
  }
  func.func @transform_5(%arg0: i32) -> (i32, i32, i32) {
    %c0_i32 = arith.constant 0 : i32
    %c0_i32_0 = arith.constant 0 : i32
    %c0_i32_1 = arith.constant 0 : i32
    return %arg0, %c0_i32, %c0_i32_0 : i32, i32, i32
  }
}

</mosaic_0001>

<bundles_post_ra>
// kernel: tile.19
= control target key start
LH: loop header
LB: loop body
LE: loop exit
PB: predicated region body
PF: predicated region fallthrough
CT: control target
= control target key end

     0   :  { %s37_s8 = smov 32   ;;  %s38_s9 = smov 64   ;;  %vm7_vm0 = vcmask 261120   ;;  %vm13_vm1 = vcmask 1048320   ;;  %vm19_vm2 = vcmask 785920   ;;  %vm25_vm3 = vcmask 523520   ;;  %s55_s0 = inlined_call_operand.vmem [shape: f32[4,32], index: 0, kind: input, shape index: {}]   ;;  %s56_s1 = inlined_call_operand.vmem [shape: f32[1,128], index: 1, kind: output, shape index: {}]  }
   0x1   :  { %v4_v0 = vld [vmem:[%s55_s0] sm:$0xf]  ;;  %s36_s0 = smov 96  }
   0x2   :  { %5 = vst [vmem:[#allocation1] sm:$0xf] %v4_v0 }
   0x9   :  { %v10_v1 = vld [vmem:[#allocation1 + $0x3] sm:$0x1]   ;;  %v22_v2 = vld [vmem:[#allocation1 + $0x1] sm:$0x1]   ;;  %v16_v3 = vld [vmem:[#allocation1 + $0x2] sm:$0x1]  }
   0xa   :  { %11 = vrot.lane.b32.xlu0 %v10_v1, %s36_s0  ;;  %23 = vrot.lane.b32.xlu1 %v22_v2, %s37_s8  ;;  %v6_v4 = vld [vmem:[#allocation1] sm:$0x1]  }
   0xb   :  { %8 = vst.msk [vmem:[#allocation0] sm:$0x1] %vm7_vm0, %v6_v4  }
  0x12   :  { %17 = vrot.lane.b32.xlu0 %v16_v3, %s38_s9 }
  0x7c   :  { %v12_v5 = vpop.permute.xlu0 %11   ;;  %v24_v6 = vpop.permute.xlu1 %23  }
  0x7d   :  { %14 = vst.msk [vmem:[#allocation0] sm:$0x1] %vm13_vm1, %v12_v5  }
  0x84   :  { %v18_v7 = vpop.permute.xlu0 %17  }
  0x85   :  { %20 = vst.msk [vmem:[#allocation0] sm:$0x1] %vm19_vm2, %v18_v7  }
  0x86   :  { %26 = vst.msk [vmem:[#allocation0] sm:$0x1] %vm25_vm3, %v24_v6  }
  0x8d   :  { %v29_v8 = vld [vmem:[#allocation0] sm:$0x1] }
  0x8e   :  { %32 = vst [vmem:[%s56_s1] sm:$0x1] %v29_v8 }

// kernel: tile.18
= control target key start
LH: loop header
LB: loop body
LE: loop exit
PB: predicated region body
PF: predicated region fallthrough
CT: control target
= control target key end

     0   :  { %s22_s0 = inlined_call_operand.vmem [shape: f32[32], index: 0, kind: input, shape index: {}]   ;;  %s23_s1 = inlined_call_operand.vmem [shape: f32[4,32], index: 1, kind: output, shape index: {}]  }
   0x1   :  { %v4_v0 = vld [vmem:[%s22_s0] ss:$0 sm:$0xff] }
   0x2   :  { %5 = vst [vmem:[%s23_s1] sm:$0xf] %v4_v0 }

// kernel: deconv_block2_forward.1
= control target key start
LH: loop header
LB: loop body
LE: loop exit
PB: predicated region body
PF: predicated region fallthrough
CT: control target
= control target key end

     0   :  { %s1639_s20 = smov 0   ;;  %s2220_s0 = inlined_call_operand.<no memory space> [shape: f32[1], index: 0, kind: input, shape index: {}]   ;;  %s2221_s1 = inlined_call_operand.vmem [shape: bf16[4,10,18,32], index: 1, kind: input, shape index: {}]   ;;  %s2222_s2 = inlined_call_operand.vmem [shape: bf16[288,128], index: 2, kind: input, shape index: {}]   ;;  %s2223_s3 = inlined_call_operand.vmem [shape: f32[1,128], index: 3, kind: input, shape index: {}]   ;;  %s2224_s4 = inlined_call_operand.vmem [shape: f32[1,128], index: 4, kind: input, shape index: {}]   ;;  %s2225_s5 = inlined_call_operand.vmem [shape: f32[4,128,128], index: 5, kind: output, shape index: {}]  }
   0x1   :  { %10 = sst [smem:[#allocation2]] %s2220_s0 }
   0x2 LB: > { %s1396_s21 = sadd.s32 4294967295, %s1601_s20   ;;  %p1400_p0 = scmp.ge.s32.totalorder %s1601_s20, 1  ;;  %s1601_s20 = sphi %s1639_s20, %s16_s20  }
   0x3   : > { %p188_p1 = scmp.lt.s32.totalorder %s1601_s20, 5 }
   0x5   : > { %p189_p2 = pnand %p1400_p0, %p188_p1 }
   0x6   : > { %p216_p3 = scmp.lt.s32.totalorder (!%p189_p2), %s1396_s21, 3  ;;  %s1603_s25 = smov (!%p189_p2), 64  }
   0x7   : > { %192 = sbr.rel (%p189_p2) target bundleno = 409 (0x199), region = 40  ;;  %s1604_s26 = smov (!%p189_p2), 96  }
   0x8   : > { %s1605_s27 = smov (!%p189_p2), 32  }
   0xc   : > { %s2231_s21 = smov (!%p216_p3, %s1396_s21), 3  ;;  %vm476_vm0 = vcmask 1042432   ;;  %vm477_vm1 = vcmask 1046532   ;;  %vm257_vm3 = vsmask.f32 3328  ;;  %vm789_vm6 = vcmask 261120  }
   0xd   : > { %s1581_s0 = smul.u32 120, %s2231_s21  ;;  %vm1655_vm2 = vmor %vm476_vm0, %vm477_vm1  ;;  %vm258_vm4 = vsmask.f32 7440  ;;  %vm814_vm7 = vcmask 523264   ;;  %vm831_vm8 = vcmask 785408  }
   0xe   : > { %vm1697_vm5 = vmor %vm257_vm3, %vm258_vm4 }
   0xf   : > { %s1653_s24 = scalar_lea.vmem %s2221_s1, %s1581_s0  ;;  %s1536_s0 = sshll.u32 %s2231_s21, 7 }
  0x10   : > { %v1660_v1 = vld [vmem:[%s1653_s24 + $0x18] sm:$0xff]  ;;  %v230_v2 = vld [vmem:[%s1653_s24 + $0xc] sm:$0xf]  ;;  %v1664_v3 = vld [vmem:[%s1653_s24 + $0x10] sm:$0xf]  ;;  %s2138_s28 = scalar_lea.vmem %s2225_s5, %s1536_s0 }
  0x11   : > { %v1667_v4 = vld [vmem:[%s1653_s24 + $0x14] sm:$0x1]  ;;  %v298_v5 = vshrl.u32 %v1664_v3, 16  ;;  %v1405_v6 = vrot.slane %v230_v2, 9  ;;  %v488_v7 = vrot.slane %v1664_v3, 5  ;;  %v285_v8 = vshrl.u32 %v230_v2, 16  ;;  %751 = vrot.lane.b32.xlu1 %v1660_v1, %s1603_s25 }
  0x12   : > { %v304_v9 = vshll.u32 %v1667_v4, 16  ;;  %v491_v10 = vrot.slane %v1667_v4, 5  ;;  %v288_v11 = vshll.u32 %v230_v2, 16  ;;  %v227_v12 = vld [vmem:[%s1653_s24] sm:$0xf]  ;;  %v1677_v13 = vld [vmem:[%s1653_s24 + $0xc] sm:$0xff] }
  0x13   : > { %v489_v14 = vsel %vm1655_vm2, %v1405_v6, %v488_v7  ;;  %v490_v15 = vrot.slane %v488_v7, 4  ;;  %v228_v16 = vld [vmem:[%s1653_s24 + $0x4] sm:$0xf]  ;;  %v229_v17 = vld [vmem:[%s1653_s24 + $0x8] sm:$0x1]  ;;  %v1404_v18 = vrot.slane %v227_v12, 9  ;;  %710 = vrot.lane.b32.xlu2 %v1677_v13, %s1604_s26 }
  0x14   : > { %v669_v19 = vunpack.c.l.b16 %v489_v14  ;;  %v481_v20 = vrot.slane %v228_v16, 5  ;;  %v484_v21 = vrot.slane %v229_v17, 5  ;;  %v261_v22 = vshrl.u32 %v227_v12, 16  ;;  %v233_v27 = vld [vmem:[%s1653_s24 + $0x18] sm:$0xf] }
  0x15   : > { %v492_v23 = vsel %vm1655_vm2, %v490_v15, %v491_v10  ;;  %v264_v24 = vshll.u32 %v227_v12, 16  ;;  %v270_v25 = vshll.u32 %v228_v16, 16  ;;  %v274_v26 = vshrl.u32 %v228_v16, 16  ;;  %v234_v32 = vld [vmem:[%s1653_s24 + $0x1c] sm:$0xf] }
  0x16   : > { %v670_v28 = vunpack.c.l.b16 %v492_v23  ;;  %v482_v29 = vsel %vm1655_vm2, %v1404_v18, %v481_v20  ;;  %v483_v30 = vrot.slane %v481_v20, 4  ;;  %v263_v31 = vrot.slane %v261_v22, 4  ;;  %v235_v37 = vld [vmem:[%s1653_s24 + $0x20] sm:$0x1]  ;;  %v247_v23 = vld [vmem:[%s1653_s24 + $0x50] sm:$0x1] }
  0x17   : > { %v667_v33 = vunpack.c.l.b16 %v482_v29  ;;  %v266_v34 = vrot.slane %v264_v24, 5  ;;  %v272_v35 = vrot.slane %v270_v25, 5  ;;  %v276_v36 = vrot.slane %v274_v26, 4 }
  0x18   : > { %v684_v38 = vpack.c.b16 %v670_v28, %v669_v19  ;;  %v485_v39 = vsel %vm1655_vm2, %v483_v30, %v484_v21  ;;  %v280_v40 = vshll.u32 %v229_v17, 16  ;;  %v1406_v41 = vrot.slane %v233_v27, 9  ;;  %v246_v17 = vld [vmem:[%s1653_s24 + $0x4c] sm:$0xf]  ;;  %v245_v19 = vld [vmem:[%s1653_s24 + $0x48] sm:$0xf] }
  0x19   : > { %v668_v42 = vunpack.c.l.b16 %v485_v39  ;;  %v267_v43 = vor.u32 %v266_v34, %v263_v31  ;;  %v277_v44 = vor.u32 %v276_v36, %v272_v35  ;;  %v495_v45 = vrot.slane %v234_v32, 5 }
  0x1a   : > { %732 = vrot.lane.b32.xlu0 %v684_v38, %s1605_s27  ;;  %v282_v47 = vrot.slane %v280_v40, 5  ;;  %v498_v48 = vrot.slane %v235_v37, 5  ;;  %v287_v49 = vrot.slane %v285_v8, 4  ;;  %v290_v50 = vrot.slane %v288_v11, 5 }
  0x1b   : > { %v683_v51 = vpack.c.b16 %v668_v42, %v667_v33  ;;  %v268_v52 = vrot.slane %v267_v43, 4  ;;  %v278_v53 = vrot.slane %v277_v44, 4  ;;  %v496_v54 = vsel %vm1655_vm2, %v1406_v41, %v495_v45  ;;  %693 = vrot.lane.b32.xlu2 %v684_v38, %s1603_s25 }
  0x1c   : > { %v497_v55 = vrot.slane %v495_v45, 4  ;;  %v671_v56 = vunpack.c.l.b16 %v496_v54  ;;  %v291_v57 = vor.u32 %v290_v50, %v287_v49  ;;  %v294_v58 = vshll.u32 %v1664_v3, 16  ;;  %v237_v45 = vld [vmem:[%s1653_s24 + $0x28] sm:$0xf] }
  0x1d   : > { %691 = vrot.lane.b32.xlu1 %v683_v51, %s1603_s25  ;;  %v273_v59 = vsel %vm1697_vm5, %v268_v52, %v272_v35  ;;  %v283_v60 = vsel %vm1697_vm5, %v278_v53, %v282_v47  ;;  %v300_v61 = vrot.slane %v298_v5, 4  ;;  %v306_v62 = vrot.slane %v304_v9, 5  ;;  %v236_v51 = vld [vmem:[%s1653_s24 + $0x24] sm:$0xf] }
  0x1e   : > { %v627_v63 = vunpack.c.l.b16 %v273_v59  ;;  %v628_v2 = vunpack.c.l.b16 %v283_v60  ;;  %v499_v4 = vsel %vm1655_vm2, %v497_v55, %v498_v48  ;;  %v292_v6 = vrot.slane %v291_v57, 4 }
  0x1f   : > { %v672_v7 = vunpack.c.l.b16 %v499_v4  ;;  %v296_v8 = vrot.slane %v294_v58, 5  ;;  %v309_v10 = vshrl.u32 %v233_v27, 16  ;;  %v312_v11 = vshll.u32 %v233_v27, 16 }
  0x20   : > { %v643_v12 = vpack.c.b16 %v628_v2, %v627_v63  ;;  %v318_v14 = vshll.u32 %v234_v32, 16  ;;  %v322_v15 = vshrl.u32 %v234_v32, 16  ;;  %v328_v16 = vshll.u32 %v235_v37, 16 }
  0x21   : > { %v1715_v3 = vpack.c.b16 %v672_v7, %v671_v56  ;;  %v297_v5 = vsel %vm1697_vm5, %v292_v6, %v296_v8  ;;  %v301_v9 = vor.u32 %v300_v61, %v296_v8  ;;  %v311_v18 = vrot.slane %v309_v10, 4  ;;  %v238_v56 = vld [vmem:[%s1653_s24 + $0x2c] sm:$0x1]  ;;  %v1748_v8 = vld [vmem:[%s1653_s24 + $0x24] sm:$0xff] }
  0x22   : > { %651 = vrot.lane.b32.xlu0 %v643_v12, %s1605_s27  ;;  %v314_v20 = vrot.slane %v312_v11, 5  ;;  %v320_v21 = vrot.slane %v318_v14, 5  ;;  %v324_v22 = vrot.slane %v322_v15, 4  ;;  %v629_v25 = vunpack.c.l.b16 %v297_v5 }
  0x23   : > { %v302_v24 = vrot.slane %v301_v9, 4  ;;  %v523_v26 = vrot.slane %v246_v17, 5  ;;  %v330_v29 = vrot.slane %v328_v16, 5  ;;  %v405_v30 = vshrl.u32 %v245_v19, 16 }
  0x24   : > { %v315_v27 = vor.u32 %v314_v20, %v311_v18  ;;  %v325_v28 = vor.u32 %v324_v22, %v320_v21  ;;  %v1410_v32 = vrot.slane %v245_v19, 9  ;;  %v526_v33 = vrot.slane %v247_v23, 5 }
  0x25   : > { %734 = vrot.lane.b32.xlu1 %v1715_v3, %s1605_s27  ;;  %v307_v31 = vsel %vm1697_vm5, %v302_v24, %v306_v62  ;;  %v408_v34 = vshll.u32 %v245_v19, 16  ;;  %v525_v38 = vrot.slane %v523_v26, 4  ;;  %v407_v39 = vrot.slane %v405_v30, 4  ;;  %v248_v30 = vld [vmem:[%s1653_s24 + $0x54] sm:$0xf] }
  0x26   : > { %v630_v35 = vunpack.c.l.b16 %v307_v31  ;;  %v316_v36 = vrot.slane %v315_v27, 4  ;;  %v326_v37 = vrot.slane %v325_v28, 4  ;;  %v414_v41 = vshll.u32 %v246_v17, 16 }
  0x27   : > { %v410_v40 = vrot.slane %v408_v34, 5  ;;  %v524_v49 = vsel %vm1655_vm2, %v1410_v32, %v523_v26  ;;  %v527_v52 = vsel %vm1655_vm2, %v525_v38, %v526_v33  ;;  %v418_v54 = vshrl.u32 %v246_v17, 16 }
  0x28   : > { %v1726_v42 = vpack.c.b16 %v630_v35, %v629_v25  ;;  %v321_v43 = vsel %vm1697_vm5, %v316_v36, %v320_v21  ;;  %v331_v44 = vsel %vm1697_vm5, %v326_v37, %v330_v29  ;;  %v416_v53 = vrot.slane %v414_v41, 5  ;;  %v249_v37 = vld [vmem:[%s1653_s24 + $0x58] sm:$0xf] }
  0x29   : > { %v631_v47 = vunpack.c.l.b16 %v321_v43  ;;  %v632_v48 = vunpack.c.l.b16 %v331_v44  ;;  %v411_v50 = vor.u32 %v410_v40, %v407_v39  ;;  %v424_v55 = vshll.u32 %v247_v23, 16 }
  0x2a   : > { %653 = vrot.lane.b32.xlu0 %v1726_v42, %s1605_s27  ;;  %v502_v59 = vrot.slane %v237_v45, 5  ;;  %v679_v60 = vunpack.c.l.b16 %v524_v49  ;;  %v420_v61 = vrot.slane %v418_v54, 4  ;;  %v333_v62 = vshrl.u32 %v236_v51, 16  ;;  %v250_v54 = vld [vmem:[%s1653_s24 + $0x5c] sm:$0x1] }
  0x2b   : > { %v1741_v57 = vpack.c.b16 %v632_v48, %v631_v47  ;;  %v412_v58 = vrot.slane %v411_v50, 4  ;;  %v336_v63 = vshll.u32 %v236_v51, 16  ;;  %v680_v2 = vunpack.c.l.b16 %v527_v52  ;;  %v239_v48 = vld [vmem:[%s1653_s24 + $0x30] sm:$0xf]  ;;  %v240_v52 = vld [vmem:[%s1653_s24 + $0x34] sm:$0xf] }
  0x2c   : > { %v1407_v4 = vrot.slane %v236_v51, 9  ;;  %v505_v6 = vrot.slane %v238_v56, 5  ;;  %v342_v7 = vshll.u32 %v237_v45, 16  ;;  %v421_v10 = vor.u32 %v420_v61, %v416_v53 }
  0x2d   : > { %712 = vrot.lane.b32.xlu1 %v1660_v1, %s1604_s26  ;;  %770 = vrot.lane.b32.xlu2 %v1741_v57, %s1604_s26  ;;  %v426_v11 = vrot.slane %v424_v55, 5  ;;  %v504_v12 = vrot.slane %v502_v59, 4  ;;  %v335_v14 = vrot.slane %v333_v62, 4  ;;  %v417_v15 = vsel %vm1697_vm5, %v412_v58, %v416_v53 }
  0x2e   : > { %v338_v16 = vrot.slane %v336_v63, 5  ;;  %v344_v17 = vrot.slane %v342_v7, 5  ;;  %v346_v5 = vshrl.u32 %v237_v45, 16  ;;  %v422_v9 = vrot.slane %v421_v10, 4 }
  0x2f   : > { %v352_v18 = vshll.u32 %v238_v56, 16  ;;  %v1752_v19 = vpack.c.b16 %v680_v2, %v679_v60  ;;  %v639_v23 = vunpack.c.l.b16 %v417_v15  ;;  %v503_v24 = vsel %vm1655_vm2, %v1407_v4, %v502_v59 }
  0x30   : > { %v339_v20 = vor.u32 %v338_v16, %v335_v14  ;;  %v348_v21 = vrot.slane %v346_v5, 4  ;;  %v427_v22 = vsel %vm1697_vm5, %v422_v9, %v426_v11  ;;  %v506_v25 = vsel %vm1655_vm2, %v504_v12, %v505_v6  ;;  %v241_v12 = vld [vmem:[%s1653_s24 + $0x38] sm:$0x1] }
  0x31   : > { %v640_v26 = vunpack.c.l.b16 %v427_v22  ;;  %v354_v29 = vrot.slane %v352_v18, 5  ;;  %v673_v31 = vunpack.c.l.b16 %v503_v24  ;;  %v674_v32 = vunpack.c.l.b16 %v506_v25  ;;  %v1787_v14 = vld [vmem:[%s1653_s24 + $0x54] sm:$0xff] }
  0x32   : > { %753 = vrot.lane.b32.xlu0 %v1748_v8, %s1603_s25  ;;  %v340_v27 = vrot.slane %v339_v20, 4  ;;  %v349_v28 = vor.u32 %v348_v21, %v344_v17  ;;  %v429_v38 = vshrl.u32 %v248_v30, 16  ;;  %v432_v39 = vshll.u32 %v248_v30, 16 }
  0x33   : > { %v1767_v35 = vpack.c.b16 %v640_v26, %v639_v23  ;;  %v438_v41 = vshll.u32 %v249_v37, 16  ;;  %v442_v43 = vshrl.u32 %v249_v37, 16  ;;  %v1772_v45 = vpack.c.b16 %v674_v32, %v673_v31 }
  0x34   : > { %v345_v33 = vsel %vm1697_vm5, %v340_v27, %v344_v17  ;;  %v350_v34 = vrot.slane %v349_v28, 4  ;;  %v530_v47 = vrot.slane %v249_v37, 5  ;;  %v431_v50 = vrot.slane %v429_v38, 4 }
  0x35   : > { %703 = vrot.lane.b32.xlu1 %v1752_v19, %s1603_s25  ;;  %v633_v36 = vunpack.c.l.b16 %v345_v33  ;;  %v434_v51 = vrot.slane %v432_v39, 5  ;;  %v357_v53 = vshrl.u32 %v239_v48, 16  ;;  %v440_v55 = vrot.slane %v438_v41, 5 }
  0x36   : > { %v355_v40 = vsel %vm1697_vm5, %v350_v34, %v354_v29  ;;  %v444_v56 = vrot.slane %v442_v43, 4  ;;  %v360_v58 = vshll.u32 %v239_v48, 16  ;;  %v366_v59 = vshll.u32 %v240_v52, 16  ;;  %v1800_v29 = vld [vmem:[%s1653_s24 + $0x30] sm:$0xff] }
  0x37   : > { %v634_v44 = vunpack.c.l.b16 %v355_v40  ;;  %v359_v60 = vrot.slane %v357_v53, 4  ;;  %v1411_v61 = vrot.slane %v248_v30, 9  ;;  %v532_v63 = vrot.slane %v530_v47, 4 }
  0x38   : > { %v362_v62 = vrot.slane %v360_v58, 5  ;;  %v533_v2 = vrot.slane %v250_v54, 5  ;;  %v368_v4 = vrot.slane %v366_v59, 5  ;;  %v370_v6 = vshrl.u32 %v240_v52, 16 }
  0x39   : > { %v1777_v49 = vpack.c.b16 %v634_v44, %v633_v36  ;;  %v435_v7 = vor.u32 %v434_v51, %v431_v50  ;;  %v445_v10 = vor.u32 %v444_v56, %v440_v55  ;;  %v448_v11 = vshll.u32 %v250_v54, 16  ;;  %v1825_v51 = vld [vmem:[%s2222_s2 + $0x78] sm:$0xff] }
  0x3a   : > { %663 = vrot.lane.b32.xlu0 %v1767_v35, %s1605_s27  ;;  %v363_v15 = vor.u32 %v362_v62, %v359_v60  ;;  %v372_v16 = vrot.slane %v370_v6, 4  ;;  %v376_v17 = vshll.u32 %v241_v12, 16  ;;  %v531_v5 = vsel %vm1655_vm2, %v1411_v61, %v530_v47  ;;  %v242_v54 = vld [vmem:[%s1653_s24 + $0x3c] sm:$0xf]  ;;  %1137 = vmatpush.bf16.msra.mxu1 %v1825_v51  ;;  %v1843_v62 = vld [vmem:[%s2222_s2 + $0x70] sm:$0xff] }
  0x3b   : > { %772 = vrot.lane.b32.xlu2 %v1777_v49, %s1604_s26  ;;  %v534_v9 = vsel %vm1655_vm2, %v532_v63, %v533_v2  ;;  %v509_v18 = vrot.slane %v240_v52, 5  ;;  %v436_v21 = vrot.slane %v435_v7, 4  ;;  %v446_v22 = vrot.slane %v445_v10, 4  ;;  %v1554_v7 = vld [vmem:[%s2222_s2 + $0x38] sm:$0xff]  ;;  %v1854_v10 = vld [vmem:[%s2222_s2 + $0x68] sm:$0xff] }
  0x3c   : > { %v373_v20 = vor.u32 %v372_v16, %v368_v4  ;;  %v450_v23 = vrot.slane %v448_v11, 5  ;;  %v364_v24 = vrot.slane %v363_v15, 4  ;;  %v378_v26 = vrot.slane %v376_v17, 5  ;;  %v1857_v11 = vld [vmem:[%s1653_s24 + $0x60] sm:$0xf]  ;;  %1088 = vmatpush.bf16.msra.mxu0 %v1554_v7  ;;  %1565 = vmatpush.bf16.msra.mxu3 %v1554_v7 }
  0x3d   : > { %736 = vrot.lane.b32.xlu1 %v1772_v45, %s1605_s27  ;;  %v681_v27 = vunpack.c.l.b16 %v531_v5  ;;  %v682_v28 = vunpack.c.l.b16 %v534_v9  ;;  %v1408_v30 = vrot.slane %v239_v48, 9  ;;  %v511_v31 = vrot.slane %v509_v18, 4  ;;  %v244_v15 = vld [vmem:[%s1653_s24 + $0x44] sm:$0x1] }
  0x3e   : > { %v374_v25 = vrot.slane %v373_v20, 4  ;;  %v512_v32 = vrot.slane %v241_v12, 5  ;;  %v441_v33 = vsel %vm1697_vm5, %v436_v21, %v440_v55  ;;  %v451_v34 = vsel %vm1697_vm5, %v446_v22, %v450_v23  ;;  %v243_v55 = vld [vmem:[%s1653_s24 + $0x40] sm:$0xf]  ;;  %1138 = vmatpush.bf16.msra.mxu1 %v1843_v62  ;;  %v1860_v12 = vld [vmem:[%s1653_s24 + $0x64] sm:$0xf] }
  0x3f   : > { %v369_v36 = vsel %vm1697_vm5, %v364_v24, %v368_v4  ;;  %v1810_v38 = vpack.c.b16 %v682_v28, %v681_v27  ;;  %v641_v39 = vunpack.c.l.b16 %v441_v33  ;;  %v642_v40 = vunpack.c.l.b16 %v451_v34  ;;  %v1545_v22 = vld [vmem:[%s1653_s24 + $0x60] sm:$0xff]  ;;  %v1564_v24 = vld [vmem:[%s2222_s2 + $0x88] sm:$0xff] }
  0x40   : > { %v379_v37 = vsel %vm1697_vm5, %v374_v25, %v378_v26  ;;  %v510_v41 = vsel %vm1655_vm2, %v1408_v30, %v509_v18  ;;  %v513_v43 = vsel %vm1655_vm2, %v511_v31, %v512_v32  ;;  %v635_v44 = vunpack.c.l.b16 %v369_v36  ;;  %1192 = vmatpush.bf16.msra.mxu2 %v1564_v24  ;;  %v1553_v30 = vld [vmem:[%s2222_s2 + $0x30] sm:$0xff]  ;;  %v1881_v31 = vld [vmem:[%s2222_s2 + $0x60] sm:$0xff] }
  0x41   : > { %v636_v47 = vunpack.c.l.b16 %v379_v37  ;;  %v675_v48 = vunpack.c.l.b16 %v510_v41  ;;  %v676_v50 = vunpack.c.l.b16 %v513_v43  ;;  %v1827_v52 = vpack.c.b16 %v642_v40, %v641_v39  ;;  %v1563_v32 = vld [vmem:[%s2222_s2 + $0x80] sm:$0xff]  ;;  %1089 = vmatpush.bf16.msra.mxu0 %v1553_v30  ;;  %v1552_v43 = vld [vmem:[%s2222_s2 + $0x28] sm:$0xff]  ;;  %1566 = vmatpush.bf16.msra.mxu3 %v1553_v30  ;;  %v1549_v24 = vld [vmem:[%s2222_s2 + $0x10] sm:$0xff] }
  0x42   : > { %655 = vrot.lane.b32.xlu0 %v1741_v57, %s1605_s27  ;;  %v381_v56 = vshrl.u32 %v242_v54, 16  ;;  %v384_v58 = vshll.u32 %v242_v54, 16  ;;  %v390_v59 = vshll.u32 %v243_v55, 16  ;;  %v394_v60 = vshrl.u32 %v243_v55, 16  ;;  %1139 = vmatpush.bf16.msra.mxu1 %v1854_v10  ;;  %v1889_v39 = vld [vmem:[%s1653_s24 + $0x3c] sm:$0xff] }
  0x43   : > { %722 = vrot.lane.b32.xlu2 %v1787_v14, %s1604_s26  ;;  %v1829_v53 = vpack.c.b16 %v636_v47, %v635_v44  ;;  %v1834_v61 = vpack.c.b16 %v676_v50, %v675_v48  ;;  %v400_v5 = vshll.u32 %v244_v15, 16  ;;  %v536_v9 = vshrl.u32 %v1857_v11, 16  ;;  %v1896_v44 = vld [vmem:[%s1653_s24 + $0x68] sm:$0x1]  ;;  %v1901_v47 = vld [vmem:[%s2222_s2 + $0x58] sm:$0xff] }
  0x44   : > { %v383_v63 = vrot.slane %v381_v56, 4  ;;  %v386_v2 = vrot.slane %v384_v58, 5  ;;  %v392_v4 = vrot.slane %v390_v59, 5  ;;  %v396_v6 = vrot.slane %v394_v60, 4  ;;  %1193 = vmatpush.bf16.msra.mxu2 %v1563_v32  ;;  %v1548_v32 = vld [vmem:[%s2222_s2 + $0x8] sm:$0xff] }
  0x45   : > { %714 = vrot.lane.b32.xlu1 %v1748_v8, %s1604_s26  ;;  %v539_v18 = vshll.u32 %v1857_v11, 16  ;;  %v545_v20 = vshll.u32 %v1860_v12, 16  ;;  %v549_v21 = vshrl.u32 %v1860_v12, 16  ;;  %v516_v23 = vrot.slane %v243_v55, 5  ;;  %1090 = vmatpush.bf16.msra.mxu0 %v1552_v43 }
  0x46   : > { %v387_v16 = vor.u32 %v386_v2, %v383_v63  ;;  %v397_v17 = vor.u32 %v396_v6, %v392_v4  ;;  %v1409_v25 = vrot.slane %v242_v54, 9  ;;  %v402_v28 = vrot.slane %v400_v5, 5  ;;  %1140 = vmatpush.bf16.msra.mxu1 %v1881_v31  ;;  %v1925_v6 = vld [vmem:[%s2222_s2 + $0x50] sm:$0xff]  ;;  %1567 = vmatpush.bf16.msra.mxu3 %v1552_v43  ;;  %v1935_v5 = vld [vmem:[%s2222_s2 + $0x48] sm:$0xff]  ;;  %v1547_v43 = vld [vmem:[%s2222_s2] sm:$0xff] }
  0x47   : > { %v538_v33 = vrot.slane %v536_v9, 4  ;;  %v541_v34 = vrot.slane %v539_v18, 5  ;;  %v547_v36 = vrot.slane %v545_v20, 5  ;;  %v551_v37 = vrot.slane %v549_v21, 4  ;;  %1526 = vmatmul.msk.bf16.vlgmr.msra.gmra.mxu2 %vm789_vm6, %v1715_v3 }
  0x48   : > { %v388_v26 = vrot.slane %v387_v16, 4  ;;  %v398_v27 = vrot.slane %v397_v17, 4  ;;  %v518_v40 = vrot.slane %v516_v23, 4  ;;  %v519_v41 = vrot.slane %v244_v15, 5  ;;  %v1550_v17 = vld [vmem:[%s2222_s2 + $0x18] sm:$0xff] }
  0x49   : > { %v517_v48 = vsel %vm1655_vm2, %v1409_v25, %v516_v23  ;;  %v542_v55 = vor.u32 %v541_v34, %v538_v33  ;;  %v552_v56 = vor.u32 %v551_v37, %v547_v36  ;;  %v555_v58 = vshll.u32 %v1896_v44, 16  ;;  %v1956_v25 = vld [vmem:[%s2222_s2 + $0x40] sm:$0xff] }
  0x4a   : > { %755 = vrot.lane.b32.xlu0 %v1800_v29, %s1603_s25  ;;  %v393_v50 = vsel %vm1697_vm5, %v388_v26, %v392_v4  ;;  %v403_v54 = vsel %vm1697_vm5, %v398_v27, %v402_v28  ;;  %v520_v59 = vsel %vm1655_vm2, %v518_v40, %v519_v41  ;;  %1141 = vmatpush.bf16.msra.mxu1 %v1901_v47  ;;  %v677_v60 = vunpack.c.l.b16 %v517_v48  ;;  %v1551_v4 = vld [vmem:[%s2222_s2 + $0x20] sm:$0xff]  ;;  %v1961_v26 = vld [vmem:[%s1653_s24 + $0x6c] sm:$0xf]  ;;  %v1964_v27 = vld [vmem:[%s1653_s24 + $0x70] sm:$0xf] }
  0x4b   : > { %695 = vrot.lane.b32.xlu2 %v1715_v3, %s1603_s25  ;;  %v637_v63 = vunpack.c.l.b16 %v393_v50  ;;  %v638_v2 = vunpack.c.l.b16 %v403_v54  ;;  %v678_v7 = vunpack.c.l.b16 %v520_v59  ;;  %v543_v3 = vrot.slane %v542_v55, 4  ;;  %1091 = vmatpush.bf16.msra.mxu0 %v1551_v4  ;;  %v1546_v59 = vld [vmem:[%s1653_s24 + $0x6c] sm:$0xff] }
  0x4c   : > { %v553_v15 = vrot.slane %v552_v56, 4  ;;  %v557_v16 = vrot.slane %v555_v58, 5  ;;  %1568 = vmatpush.bf16.msra.mxu3 %v1551_v4  ;;  %v564_v28 = vrot.slane %v1860_v12, 5  ;;  %v570_v33 = vshrl.u32 %v1961_v26, 16 }
  0x4d   : > { %705 = vrot.lane.b32.xlu1 %v1810_v38, %s1603_s25  ;;  %v1937_v9 = vpack.c.b16 %v638_v2, %v637_v63  ;;  %v1939_v18 = vpack.c.b16 %v678_v7, %v677_v60  ;;  %v548_v20 = vsel %vm1697_vm5, %v543_v3, %v547_v36  ;;  %v573_v34 = vshll.u32 %v1961_v26, 16 }
  0x4e   : > { %1142 = vmatpush.bf16.msra.mxu1 %v1925_v6  ;;  %v558_v21 = vsel %vm1697_vm5, %v553_v15, %v557_v16  ;;  %v579_v36 = vshll.u32 %v1964_v27, 16  ;;  %v583_v37 = vshrl.u32 %v1964_v27, 16  ;;  %v1412_v12 = vrot.slane %v1857_v11, 9 }
  0x4f   : > { %1092 = vmatpush.bf16.msra.mxu0 %v1550_v17  ;;  %v727_v23 = vunpack.c.l.b16 %v558_v21  ;;  %v566_v40 = vrot.slane %v564_v28, 4  ;;  %v567_v41 = vrot.slane %v1896_v44, 5  ;;  %v572_v48 = vrot.slane %v570_v33, 4  ;;  %v1991_v44 = vld [vmem:[%s1653_s24 + $0x48] sm:$0xff] }
  0x50   : > { %1569 = vmatpush.bf16.msra.mxu3 %v1550_v17  ;;  %v575_v11 = vrot.slane %v573_v34, 5  ;;  %v581_v50 = vrot.slane %v579_v36, 5  ;;  %v585_v54 = vrot.slane %v583_v37, 4  ;;  %v565_v55 = vsel %vm1655_vm2, %v1412_v12, %v564_v28 }
  0x51   : > { %v568_v56 = vsel %vm1655_vm2, %v566_v40, %v567_v41  ;;  %v729_v4 = vunpack.c.l.b16 %v565_v55 }
  0x52   : > { %665 = vrot.lane.b32.xlu0 %v1827_v52, %s1605_s27  ;;  %1143 = vmatpush.bf16.msra.mxu1 %v1935_v5  ;;  %v576_v60 = vor.u32 %v575_v11, %v572_v48  ;;  %v586_v63 = vor.u32 %v585_v54, %v581_v50  ;;  %v730_v7 = vunpack.c.l.b16 %v568_v56 }
  0x53   : > { %774 = vrot.lane.b32.xlu2 %v1829_v53, %s1604_s26  ;;  %1093 = vmatpush.bf16.msra.mxu0 %v1549_v24 }
  0x54   : > { %1570 = vmatpush.bf16.msra.mxu3 %v1549_v24  ;;  %v577_v3 = vrot.slane %v576_v60, 4  ;;  %v587_v15 = vrot.slane %v586_v63, 4  ;;  %v2009_v17 = vpack.c.b16 %v730_v7, %v729_v4 }
  0x55   : > { %738 = vrot.lane.b32.xlu1 %v1834_v61, %s1605_s27 }
  0x56   : > { %1144 = vmatpush.bf16.msra.mxu1 %v1956_v25 }
  0x57   : > { %1094 = vmatpush.bf16.msra.mxu0 %v1548_v32  ;;  %1527 = vmatmul.msk.bf16.gmra.mxu2 %vm789_vm6, %v1772_v45 }
  0x58   : > { %1571 = vmatpush.bf16.msra.mxu3 %v1548_v32  ;;  %v1537_v32 = vld [vmem:[%s1653_s24] sm:$0xff] }
  0x5a   : > { %657 = vrot.lane.b32.xlu0 %v1777_v49, %s1605_s27 }
  0x5b   : > { %724 = vrot.lane.b32.xlu2 %v1545_v22, %s1604_s26  ;;  %1095 = vmatpush.bf16.msra.mxu0 %v1547_v43 }
  0x5c   : > { %1572 = vmatpush.bf16.msra.mxu3 %v1547_v43 }
  0x5d   : > { %716 = vrot.lane.b32.xlu1 %v1800_v29, %s1604_s26 }
  0x60   : > { %1573 = vmatpush.bf16.msrb.mxu3 %v1825_v51  ;;  %v582_v51 = vsel %vm1697_vm5, %v577_v3, %v581_v50 }
  0x62   : > { %757 = vrot.lane.b32.xlu0 %v1889_v39, %s1603_s25 }
  0x63   : > { %697 = vrot.lane.b32.xlu2 %v1772_v45, %s1603_s25  ;;  %v1994_v45 = vld [vmem:[%s1653_s24 + $0x74] sm:$0x1]  ;;  %s1275_s24 = sld [smem:[#allocation2]] }
  0x64   : > { %v589_v2 = vshll.u32 %v1994_v45, 16  ;;  %1574 = vmatpush.bf16.msrb.mxu3 %v1843_v62  ;;  %v767_v62 = vunpack.c.l.b16 %v582_v51 }
  0x65   : > { %763 = vrot.lane.b32.xlu1 %v1545_v22, %s1603_s25  ;;  %v726_v22 = vunpack.c.l.b16 %v548_v20 }
  0x66   : > { %v591_v16 = vrot.slane %v589_v2, 5 }
  0x67   : > { %v1968_v30 = vpack.c.b16 %v727_v23, %v726_v22  ;;  %1528 = vmatmul.msk.bf16.gmra.mxu2 %vm789_vm6, %v1834_v61 }
  0x68   : > { %v592_v20 = vsel %vm1697_vm5, %v587_v15, %v591_v16  ;;  %1575 = vmatpush.bf16.msrb.mxu3 %v1854_v10 }
  0x69   : > { %v768_v22 = vunpack.c.l.b16 %v592_v20 }
  0x6a   : > { %744 = vrot.lane.b32.xlu0 %v1810_v38, %s1605_s27 }
  0x6b   : > { %776 = vrot.lane.b32.xlu2 %v1937_v9, %s1604_s26  ;;  %v769_v46 = vpack.c.b16 %v768_v22, %v767_v62 }
  0x6c   : > { %1576 = vmatpush.bf16.msrb.mxu3 %v1881_v31 }
  0x6d   : > { %740 = vrot.lane.b32.xlu1 %v1939_v18, %s1605_s27  ;;  %v711_v58 = vpop.permute.xlu2 %710 }
  0x70   : > { %1577 = vmatpush.bf16.msrb.mxu3 %v1901_v47 }
  0x72   : > { %659 = vrot.lane.b32.xlu0 %v1829_v53, %s1605_s27 }
  0x73   : > { %782 = vrot.lane.b32.xlu2 %v1968_v30, %s1604_s26 }
  0x74   : > { %1578 = vmatpush.bf16.msrb.mxu3 %v1925_v6 }
  0x75   : > { %718 = vrot.lane.b32.xlu1 %v1889_v39, %s1604_s26  ;;  %v694_v21 = vpop.permute.xlu2 %693 }
  0x77   : > { %1529 = vmatmul.msk.bf16.gmra.mxu2 %vm789_vm6, %v1939_v18 }
  0x78   : > { %1579 = vmatpush.bf16.msrb.mxu3 %v1935_v5 }
  0x7a   : > { %759 = vrot.lane.b32.xlu0 %v1991_v44, %s1603_s25 }
  0x7b   : > { %699 = vrot.lane.b32.xlu2 %v1834_v61, %s1603_s25 }
  0x7c   : > { %1580 = vmatpush.bf16.msrb.mxu3 %v1956_v25 }
  0x7d   : > { %765 = vrot.lane.b32.xlu1 %v1546_v59, %s1603_s25 }
  0x82   : > { %746 = vrot.lane.b32.xlu0 %v2009_v17, %s1605_s27 }
  0x83   : > { %778 = vrot.lane.b32.xlu2 %v1767_v35, %s1604_s26  ;;  %v752_v23 = vpop.permute.xlu1 %751 }
  0x85   : > { %742 = vrot.lane.b32.xlu1 %v1752_v19, %s1605_s27 }
  0x87   : > { %v771_v10 = vpop.permute.xlu2 %770  ;;  %1530 = vmatmul.msk.bf16.gmra.mxu2 %vm789_vm6, %v1752_v19 }
  0x8a   : > { %661 = vrot.lane.b32.xlu0 %v1937_v9, %s1605_s27 }
  0x8b   : > { %784 = vrot.lane.b32.xlu2 %v769_v46, %s1604_s26 }
  0x8c   : > { %v733_v61 = vpop.permute.xlu0 %732 }
  0x8d   : > { %v858_v24 = vsel %vm789_vm6, %v1726_v42, %v733_v61  ;;  %720 = vrot.lane.b32.xlu1 %v1991_v44, %s1604_s26 }
  0x8e   : > { %v881_v31 = vsel %vm814_vm7, %v858_v24, %v752_v23 }
  0x8f   : > { %v692_v47 = vpop.permute.xlu1 %691  ;;  %v897_v28 = vsel %vm831_vm8, %v881_v31, %v771_v10 }
  0x90   : > { %1145 = vmatmul.bf16.vlgmr.msra.gmra.mxu1 %v897_v28 }
  0x92   : > { %761 = vrot.lane.b32.xlu0 %v1787_v14, %s1603_s25 }
  0x93   : > { %701 = vrot.lane.b32.xlu2 %v1939_v18, %s1603_s25 }
  0x94   : > { %v652_v42 = vpop.permute.xlu0 %651 }
  0x95   : > { %v792_v6 = vsel %vm789_vm6, %v1537_v32, %v652_v42  ;;  %v773_v34 = vpop.permute.xlu2 %772  ;;  %v1413_v32 = vrot.slane %v1961_v26, 9 }
  0x96   : > { %v816_v33 = vsel %vm814_vm7, %v792_v6, %v692_v47  ;;  %v601_v6 = vrot.slane %v1994_v45, 5 }
  0x97   : > { %v735_v36 = vpop.permute.xlu1 %734  ;;  %v833_v5 = vsel %vm831_vm8, %v816_v33, %v711_v58  ;;  %1531 = vmatmul.msk.bf16.gmra.mxu2 %vm789_vm6, %v1810_v38 }
  0x98   : > { %1096 = vmatmul.bf16.vlgmr.msra.gmra.mxu0 %v833_v5  ;;  %v861_v25 = vsel %vm789_vm6, %v1741_v57, %v735_v36 }
  0x9b   : > { %780 = vrot.lane.b32.xlu2 %v1827_v52, %s1604_s26 }
  0x9c   : > { %v654_v37 = vpop.permute.xlu0 %653 }
  0x9d   : > { %v723_v12 = vpop.permute.xlu2 %722  ;;  %v795_v18 = vsel %vm789_vm6, %v1677_v13, %v654_v37 }
  0x9e   : > { %v818_v43 = vsel %vm814_vm7, %v795_v18, %v694_v21 }
  0x9f   : > { %v713_v40 = vpop.permute.xlu1 %712 }
  0xa0   : > { %v836_v55 = vsel %vm831_vm8, %v818_v43, %v713_v40 }
  0xa4   : > { %v754_v41 = vpop.permute.xlu0 %753 }
  0xa5   : > { %v883_v48 = vsel %vm814_vm7, %v861_v25, %v754_v41  ;;  %v696_v50 = vpop.permute.xlu2 %695 }
  0xa6   : > { %v900_v11 = vsel %vm831_vm8, %v883_v48, %v773_v34 }
  0xa7   : > { %v704_v54 = vpop.permute.xlu1 %703  ;;  %1150 = vmatmul.bf16.gmra.mxu1 %v900_v11  ;;  %1532 = vmatmul.msk.bf16.gmra.mxu2 %vm789_vm6, %v2009_v17 }
  0xa8   : > { %1101 = vmatmul.bf16.gmra.mxu0 %v836_v55 }
  0xac   : > { %v664_v13 = vpop.permute.xlu0 %663 }
  0xad   : > { %v810_v19 = vsel %vm789_vm6, %v1991_v44, %v664_v13  ;;  %v775_v57 = vpop.permute.xlu2 %774 }
  0xae   : > { %v828_v56 = vsel %vm814_vm7, %v810_v19, %v704_v54 }
  0xaf   : > { %v737_v58 = vpop.permute.xlu1 %736  ;;  %v851_v59 = vsel %vm831_vm8, %v828_v56, %v723_v12 }
  0xb0   : > { %1126 = vmatmul.bf16.vlgmr.msra.gmra.mxu3 %v851_v59  ;;  %v864_v3 = vsel %vm789_vm6, %v1777_v49, %v737_v58 }
  0xb4   : > { %v656_v60 = vpop.permute.xlu0 %655 }
  0xb5   : > { %v798_v63 = vsel %vm789_vm6, %v1660_v1, %v656_v60  ;;  %v725_v4 = vpop.permute.xlu2 %724 }
  0xb6   : > { %v820_v2 = vsel %vm814_vm7, %v798_v63, %v696_v50 }
  0xb7   : > { %v715_v7 = vpop.permute.xlu1 %714 }
  0xb8   : > { %v839_v44 = vsel %vm831_vm8, %v820_v2, %v715_v7 }
  0xb9   : > { %1106 = vmatmul.bf16.gmra.mxu0 %v839_v44 }
  0xbc   : > { %v756_v15 = vpop.permute.xlu0 %755 }
  0xbd   : > { %v885_v16 = vsel %vm814_vm7, %v864_v3, %v756_v15  ;;  %v698_v38 = vpop.permute.xlu2 %697 }
  0xbe   : > { %v903_v51 = vsel %vm831_vm8, %v885_v16, %v775_v57 }
  0xbf   : > { %v706_v20 = vpop.permute.xlu1 %705  ;;  %1155 = vmatmul.bf16.gmra.mxu1 %v903_v51 }
  0xc4   : > { %v666_v1 = vpop.permute.xlu0 %665 }
  0xc5   : > { %v813_v21 = vsel %vm789_vm6, %v1787_v14, %v666_v1  ;;  %v777_v23 = vpop.permute.xlu2 %776  ;;  %v598_v14 = vrot.slane %v1964_v27, 5 }
  0xc6   : > { %v830_v62 = vsel %vm814_vm7, %v813_v21, %v706_v20 }
  0xc7   : > { %v739_v22 = vpop.permute.xlu1 %738  ;;  %v854_v49 = vsel %vm831_vm8, %v830_v62, %v725_v4  ;;  %v600_v42 = vrot.slane %v598_v14, 4  ;;  %v599_v34 = vsel %vm1655_vm2, %v1413_v32, %v598_v14 }
  0xc8   : > { %1131 = vmatmul.bf16.gmra.mxu3 %v854_v49  ;;  %v867_v47 = vsel %vm789_vm6, %v1829_v53, %v739_v22  ;;  %v786_v5 = vunpack.c.l.b16 %v599_v34 }
  0xc9   : > { %v602_v36 = vsel %vm1655_vm2, %v600_v42, %v601_v6 }
  0xca   : > { %v787_v53 = vunpack.c.l.b16 %v602_v36  ;;  %v1195_v54 = vpop.f32.mrf.mxu2 }
  0xcc   : > { %v658_v46 = vpop.permute.xlu0 %657  ;;  %v788_v37 = vpack.c.b16 %v787_v53, %v786_v5 }
  0xcd   : > { %v801_v61 = vsel %vm789_vm6, %v1748_v8, %v658_v46  ;;  %v783_v31 = vpop.permute.xlu2 %782 }
  0xce   : > { %v822_v10 = vsel %vm814_vm7, %v801_v61, %v698_v38  ;;  %1533 = vmatmul.msk.bf16.gmra.mxu2 %vm789_vm6, %v788_v37 }
  0xcf   : > { %v717_v24 = vpop.permute.xlu1 %716 }
  0xd0   : > { %v842_v17 = vsel %vm831_vm8, %v822_v10, %v717_v24  ;;  %v2132_v10 = vstv %s1275_s24 }
  0xd1   : > { %1111 = vmatmul.bf16.gmra.mxu0 %v842_v17 }
  0xd4   : > { %v758_v28 = vpop.permute.xlu0 %757 }
  0xd5   : > { %v887_v8 = vsel %vm814_vm7, %v867_v47, %v758_v28  ;;  %v700_v12 = vpop.permute.xlu2 %699 }
  0xd6   : > { %v906_v33 = vsel %vm831_vm8, %v887_v8, %v777_v23  ;;  %v2123_v23 = vld [vmem:[%s2223_s3] ss:$0 sm:$0xff] }
  0xd7   : > { %v764_v27 = vpop.permute.xlu1 %763  ;;  %1160 = vmatmul.bf16.gmra.mxu1 %v906_v33 }
  0xdc   : > { %v745_v26 = vpop.permute.xlu0 %744 }
  0xdd   : > { %v876_v45 = vsel %vm789_vm6, %v1827_v52, %v745_v26  ;;  %v779_v43 = vpop.permute.xlu2 %778 }
  0xde   : > { %v893_v40 = vsel %vm814_vm7, %v876_v45, %v764_v27 }
  0xdf   : > { %v741_v18 = vpop.permute.xlu1 %740  ;;  %v915_v25 = vsel %vm831_vm8, %v893_v40, %v783_v31 }
  0xe0   : > { %1175 = vmatmul.bf16.vlgmr.msrb.gmra.mxu3 %v915_v25  ;;  %v870_v52 = vsel %vm789_vm6, %v1937_v9, %v741_v18 }
  0xe4   : > { %v660_v0 = vpop.permute.xlu0 %659 }
  0xe5   : > { %v804_v41 = vsel %vm789_vm6, %v1800_v29, %v660_v0  ;;  %v785_v57 = vpop.permute.xlu2 %784  ;;  %v1197_v29 = vpop.f32.mrf.mxu2 }
  0xe6   : > { %v824_v48 = vsel %vm814_vm7, %v804_v41, %v700_v12 }
  0xe7   : > { %v719_v11 = vpop.permute.xlu1 %718 }
  0xe8   : > { %v845_v50 = vsel %vm831_vm8, %v824_v48, %v719_v11 }
  0xe9   : > { %1116 = vmatmul.bf16.gmra.mxu0 %v845_v50 }
  0xec   : > { %v760_v55 = vpop.permute.xlu0 %759 }
  0xed   : > { %v889_v13 = vsel %vm814_vm7, %v870_v52, %v760_v55  ;;  %v702_v9 = vpop.permute.xlu2 %701  ;;  %v1200_v44 = vpop.f32.mrf.mxu2 }
  0xee   : > { %v909_v19 = vsel %vm831_vm8, %v889_v13, %v779_v43 }
  0xef   : > { %v766_v56 = vpop.permute.xlu1 %765  ;;  %1165 = vmatmul.bf16.gmra.mxu1 %v909_v19 }
  0xf4   : > { %v747_v58 = vpop.permute.xlu0 %746 }
  0xf5   : > { %v879_v59 = vsel %vm789_vm6, %v1968_v30, %v747_v58  ;;  %v781_v51 = vpop.permute.xlu2 %780  ;;  %v1202_v21 = vpop.f32.mrf.mxu2 }
  0xf6   : > { %v895_v60 = vsel %vm814_vm7, %v879_v59, %v766_v56 }
  0xf7   : > { %v743_v63 = vpop.permute.xlu1 %742  ;;  %v918_v2 = vsel %vm831_vm8, %v895_v60, %v785_v57 }
  0xf8   : > { %1180 = vmatmul.bf16.gmra.mxu3 %v918_v2  ;;  %v873_v30 = vsel %vm789_vm6, %v1767_v35, %v743_v63  ;;  %v2128_v35 = vld [vmem:[%s2224_s4] ss:$0 sm:$0xff] }
  0xfc   : > { %v662_v4 = vpop.permute.xlu0 %661 }
  0xfd   : > { %v807_v7 = vsel %vm789_vm6, %v1889_v39, %v662_v4  ;;  %v1205_v39 = vpop.f32.mrf.mxu2 }
  0xfe   : > { %v826_v3 = vsel %vm814_vm7, %v807_v7, %v702_v9 }
  0xff   : > { %v721_v15 = vpop.permute.xlu1 %720 }
 0x100   : > { %v848_v16 = vsel %vm831_vm8, %v826_v3, %v721_v15 }
 0x101   : > { %1121 = vmatmul.bf16.gmra.mxu0 %v848_v16 }
 0x104   : > { %v762_v38 = vpop.permute.xlu0 %761 }
 0x105   : > { %v891_v20 = vsel %vm814_vm7, %v873_v30, %v762_v38  ;;  %v1207_v24 = vpop.f32.mrf.mxu2 }
 0x106   : > { %v912_v1 = vsel %vm831_vm8, %v891_v20, %v781_v51 }
 0x107   : > { %1170 = vmatmul.bf16.gmra.mxu1 %v912_v1 }
 0x10d   : > { %v1146_v62 = vpop.f32.mrf.mxu1  ;;  %v1210_v36 = vpop.f32.mrf.mxu2 }
 0x115   : > { %v1097_v22 = vpop.f32.mrf.mxu0  ;;  %v1148_v31 = vpop.f32.mrf.mxu1 }
 0x116   : > { %v1147_v49 = vadd.f32 %v1146_v62, %v1097_v22  ;;  %v1212_v0 = vpop.f32.mrf.mxu2 }
 0x118   : > { %v1196_v46 = vadd.f32 %v1195_v54, %v1147_v49 }
 0x11a   : > { %v1239_v61 = vmul.f32 %v2123_v23, %v1196_v46 }
 0x11c   : > { %v1259_v17 = vadd.f32 %v2128_v35, %v1239_v61 }
 0x11d   : > { %v1099_v14 = vpop.f32.mrf.mxu0 }
 0x11e   : > { %vm1276_vm9 = vcmp.gt.f32.partialorder %v1259_v17, 0.0  ;;  %v1293_v47 = vmul.f32 %v2132_v10, %v1259_v17  ;;  %v1149_v28 = vadd.f32 %v1148_v31, %v1099_v14  ;;  %v2154_v52 = vpop.f32.mrf.mxu2 }
 0x120   : > { %v1309_v32 = vsel %vm1276_vm9, %v1259_v17, %v1293_v47  ;;  %v1198_v42 = vadd.f32 %v1197_v29, %v1149_v28 }
 0x121   : > { %1325 = vst [vmem:[%s2138_s28] sm:$0xff] %v1309_v32 }
 0x122   : > { %v1240_v6 = vmul.f32 %v2123_v23, %v1198_v42 }
 0x124   : > { %v1260_v8 = vadd.f32 %v2128_v35, %v1240_v6  ;;  %v1151_v33 = vpop.f32.mrf.mxu1 }
 0x125   : > { %v1102_v34 = vpop.f32.mrf.mxu0 }
 0x126   : > { %vm1277_vm10 = vcmp.gt.f32.partialorder %v1260_v8, 0.0  ;;  %v1294_v27 = vmul.f32 %v2132_v10, %v1260_v8  ;;  %v1152_v5 = vadd.f32 %v1151_v33, %v1102_v34  ;;  %v2158_v59 = vpop.f32.mrf.mxu2 }
 0x128   : > { %v1310_v53 = vsel %vm1277_vm10, %v1260_v8, %v1294_v27  ;;  %v1201_v37 = vadd.f32 %v1200_v44, %v1152_v5 }
 0x129   : > { %1326 = vst [vmem:[%s2138_s28 + $0x8] sm:$0xff] %v1310_v53 }
 0x12a   : > { %v1241_v12 = vmul.f32 %v2123_v23, %v1201_v37 }
 0x12c   : > { %v1261_v26 = vadd.f32 %v2128_v35, %v1241_v12  ;;  %v1153_v45 = vpop.f32.mrf.mxu1 }
 0x12d   : > { %v1104_v40 = vpop.f32.mrf.mxu0 }
 0x12e   : > { %vm1278_vm11 = vcmp.gt.f32.partialorder %v1261_v26, 0.0  ;;  %v1295_v18 = vmul.f32 %v2132_v10, %v1261_v26  ;;  %v1154_v25 = vadd.f32 %v1153_v45, %v1104_v40  ;;  %v2165_v51 = vpop.f32.mrf.mxu2 }
 0x130   : > { %v1311_v41 = vsel %vm1278_vm11, %v1261_v26, %v1295_v18  ;;  %v1203_v43 = vadd.f32 %v1202_v21, %v1154_v25 }
 0x131   : > { %1327 = vst [vmem:[%s2138_s28 + $0x10] sm:$0xff] %v1311_v41 }
 0x132   : > { %v1242_v48 = vmul.f32 %v2123_v23, %v1203_v43 }
 0x133   : > { %v1127_v56 = vpop.f32.mrf.mxu3 }
 0x134   : > { %v1262_v11 = vadd.f32 %v2128_v35, %v1242_v48 }
 0x136   : > { %vm1279_vm12 = vcmp.gt.f32.partialorder %v1262_v11, 0.0  ;;  %v1296_v50 = vmul.f32 %v2132_v10, %v1262_v11  ;;  %v1107_v55 = vpop.f32.mrf.mxu0  ;;  %v2168_v62 = vpop.f32.mrf.mxu2 }
 0x138   : > { %v1312_v54 = vsel %vm1279_vm12, %v1262_v11, %v1296_v50 }
 0x139   : > { %1328 = vst [vmem:[%s2138_s28 + $0x18] sm:$0xff] %v1312_v54 }
 0x13b   : > { %v1129_v44 = vpop.f32.mrf.mxu3 }
 0x13c   : > { %v1156_v13 = vpop.f32.mrf.mxu1 }
 0x13d   : > { %v1157_v19 = vadd.f32 %v1156_v13, %v1107_v55 }
 0x13e   : > { %v1109_v60 = vpop.f32.mrf.mxu0  ;;  %v1225_v32 = vpop.f32.mrf.mxu2 }
 0x13f   : > { %v1206_v57 = vadd.f32 %v1205_v39, %v1157_v19 }
 0x141   : > { %v1243_v29 = vmul.f32 %v2123_v23, %v1206_v57 }
 0x143   : > { %v1263_v58 = vadd.f32 %v2128_v35, %v1243_v29 }
 0x144   : > { %v1158_v63 = vpop.f32.mrf.mxu1 }
 0x145   : > { %vm1280_vm13 = vcmp.gt.f32.partialorder %v1263_v58, 0.0  ;;  %v1297_v2 = vmul.f32 %v2132_v10, %v1263_v58  ;;  %v1159_v9 = vadd.f32 %v1158_v63, %v1109_v60 }
 0x146   : > { %v1227_v12 = vpop.f32.mrf.mxu2 }
 0x147   : > { %v1313_v4 = vsel %vm1280_vm13, %v1263_v58, %v1297_v2  ;;  %v1208_v7 = vadd.f32 %v1207_v24, %v1159_v9 }
 0x148   : > { %1329 = vst [vmem:[%s2138_s28 + $0x20] sm:$0xff] %v1313_v4 }
 0x149   : > { %v1244_v3 = vmul.f32 %v2123_v23, %v1208_v7 }
 0x14b   : > { %v1264_v15 = vadd.f32 %v2128_v35, %v1244_v3  ;;  %v1132_v38 = vpop.f32.mrf.mxu3 }
 0x14d   : > { %vm1281_vm14 = vcmp.gt.f32.partialorder %v1264_v15, 0.0  ;;  %v1298_v16 = vmul.f32 %v2132_v10, %v1264_v15 }
 0x14e   : > { %v1112_v20 = vpop.f32.mrf.mxu0 }
 0x14f   : > { %v1314_v30 = vsel %vm1281_vm14, %v1264_v15, %v1298_v16 }
 0x150   : > { %1330 = vst [vmem:[%s2138_s28 + $0x28] sm:$0xff] %v1314_v30 }
 0x151   : > { %v1230_v60 = vpop.f32.mrf.mxu2 }
 0x153   : > { %v2171_v49 = vpop.f32.mrf.mxu3 }
 0x154   : > { %v1161_v1 = vpop.f32.mrf.mxu1 }
 0x155   : > { %v1162_v21 = vadd.f32 %v1161_v1, %v1112_v20 }
 0x156   : > { %v1114_v61 = vpop.f32.mrf.mxu0 }
 0x157   : > { %v1211_v39 = vadd.f32 %v1210_v36, %v1162_v21 }
 0x159   : > { %v1245_v22 = vmul.f32 %v2123_v23, %v1211_v39  ;;  %v1232_v30 = vpop.f32.mrf.mxu2 }
 0x15b   : > { %v1265_v46 = vadd.f32 %v2128_v35, %v1245_v22 }
 0x15c   : > { %v1163_v24 = vpop.f32.mrf.mxu1 }
 0x15d   : > { %vm1282_vm15 = vcmp.gt.f32.partialorder %v1265_v46, 0.0  ;;  %v1299_v17 = vmul.f32 %v2132_v10, %v1265_v46  ;;  %v1164_v31 = vadd.f32 %v1163_v24, %v1114_v61 }
 0x15f   : > { %v1315_v14 = vsel %vm1282_vm15, %v1265_v46, %v1299_v17  ;;  %v1213_v47 = vadd.f32 %v1212_v0, %v1164_v31 }
 0x160   : > { %1331 = vst [vmem:[%s2138_s28 + $0x30] sm:$0xff] %v1315_v14 }
 0x161   : > { %v1246_v28 = vmul.f32 %v2123_v23, %v1213_v47 }
 0x163   : > { %v1266_v42 = vadd.f32 %v2128_v35, %v1246_v28  ;;  %v1176_v6 = vpop.f32.mrf.mxu3 }
 0x164   : > { %v1177_v8 = vadd.f32 %v1176_v6, %v1127_v56 }
 0x165   : > { %vm1283_vm0 = vcmp.gt.f32.partialorder %v1266_v42, 0.0  ;;  %v1300_v33 = vmul.f32 %v2132_v10, %v1266_v42 }
 0x166   : > { %v1226_v34 = vadd.f32 %v1225_v32, %v1177_v8  ;;  %v1117_v5 = vpop.f32.mrf.mxu0 }
 0x167   : > { %v1316_v36 = vsel %vm1283_vm0, %v1266_v42, %v1300_v33 }
 0x168   : > { %1332 = vst [vmem:[%s2138_s28 + $0x38] sm:$0xff] %v1316_v36  ;;  %v1251_v27 = vmul.f32 %v2123_v23, %v1226_v34 }
 0x16a   : > { %v1271_v53 = vadd.f32 %v2128_v35, %v1251_v27 }
 0x16b   : > { %v1178_v37 = vpop.f32.mrf.mxu3 }
 0x16c   : > { %vm1288_vm1 = vcmp.gt.f32.partialorder %v1271_v53, 0.0  ;;  %v1305_v26 = vmul.f32 %v2132_v10, %v1271_v53  ;;  %v1179_v45 = vadd.f32 %v1178_v37, %v1129_v44  ;;  %v1166_v40 = vpop.f32.mrf.mxu1 }
 0x16d   : > { %v1167_v18 = vadd.f32 %v1166_v40, %v1117_v5 }
 0x16e   : > { %v1321_v25 = vsel %vm1288_vm1, %v1271_v53, %v1305_v26  ;;  %v1228_v0 = vadd.f32 %v1227_v12, %v1179_v45  ;;  %v1119_v54 = vpop.f32.mrf.mxu0 }
 0x16f   : > { %1337 = vst [vmem:[%s2138_s28 + $0x60] sm:$0xff] %v1321_v25  ;;  %v1216_v41 = vadd.f32 %v2154_v52, %v1167_v18 }
 0x170   : > { %v1252_v43 = vmul.f32 %v2123_v23, %v1228_v0 }
 0x171   : > { %v1247_v48 = vmul.f32 %v2123_v23, %v1216_v41 }
 0x172   : > { %v1272_v11 = vadd.f32 %v2128_v35, %v1252_v43 }
 0x173   : > { %v1267_v50 = vadd.f32 %v2128_v35, %v1247_v48 }
 0x174   : > { %vm1289_vm2 = vcmp.gt.f32.partialorder %v1272_v11, 0.0  ;;  %v1306_v55 = vmul.f32 %v2132_v10, %v1272_v11  ;;  %v1168_v13 = vpop.f32.mrf.mxu1 }
 0x175   : > { %vm1284_vm3 = vcmp.gt.f32.partialorder %v1267_v50, 0.0  ;;  %v1301_v19 = vmul.f32 %v2132_v10, %v1267_v50  ;;  %v1169_v56 = vadd.f32 %v1168_v13, %v1119_v54 }
 0x176   : > { %v1322_v52 = vsel %vm1289_vm2, %v1272_v11, %v1306_v55 }
 0x177   : > { %v1317_v57 = vsel %vm1284_vm3, %v1267_v50, %v1301_v19  ;;  %1338 = vst [vmem:[%s2138_s28 + $0x68] sm:$0xff] %v1322_v52  ;;  %v1218_v29 = vadd.f32 %v2158_v59, %v1169_v56 }
 0x178   : > { %1333 = vst [vmem:[%s2138_s28 + $0x40] sm:$0xff] %v1317_v57 }
 0x179   : > { %v1248_v58 = vmul.f32 %v2123_v23, %v1218_v29 }
 0x17b   : > { %v1268_v63 = vadd.f32 %v2128_v35, %v1248_v58  ;;  %v1181_v2 = vpop.f32.mrf.mxu3 }
 0x17c   : > { %v1182_v9 = vadd.f32 %v1181_v2, %v1132_v38 }
 0x17d   : > { %vm1285_vm4 = vcmp.gt.f32.partialorder %v1268_v63, 0.0  ;;  %v1302_v4 = vmul.f32 %v2132_v10, %v1268_v63 }
 0x17e   : > { %v1231_v7 = vadd.f32 %v1230_v60, %v1182_v9  ;;  %v1122_v15 = vpop.f32.mrf.mxu0 }
 0x17f   : > { %v1318_v44 = vsel %vm1285_vm4, %v1268_v63, %v1302_v4 }
 0x180   : > { %1334 = vst [vmem:[%s2138_s28 + $0x48] sm:$0xff] %v1318_v44  ;;  %v1253_v3 = vmul.f32 %v2123_v23, %v1231_v7 }
 0x182   : > { %v1273_v59 = vadd.f32 %v2128_v35, %v1253_v3 }
 0x183   : > { %v1183_v16 = vpop.f32.mrf.mxu3 }
 0x184   : > { %vm1290_vm5 = vcmp.gt.f32.partialorder %v1273_v59, 0.0  ;;  %v1307_v20 = vmul.f32 %v2132_v10, %v1273_v59  ;;  %v1184_v1 = vadd.f32 %v1183_v16, %v2171_v49  ;;  %v1171_v38 = vpop.f32.mrf.mxu1 }
 0x185   : > { %v1172_v21 = vadd.f32 %v1171_v38, %v1122_v15 }
 0x186   : > { %v1323_v39 = vsel %vm1290_vm5, %v1273_v59, %v1307_v20  ;;  %v1233_v22 = vadd.f32 %v1232_v30, %v1184_v1  ;;  %v1124_v14 = vpop.f32.mrf.mxu0 }
 0x187   : > { %1339 = vst [vmem:[%s2138_s28 + $0x70] sm:$0xff] %v1323_v39  ;;  %v1221_v46 = vadd.f32 %v2165_v51, %v1172_v21 }
 0x188   : > { %v1254_v61 = vmul.f32 %v2123_v23, %v1233_v22 }
 0x189   : > { %v1249_v24 = vmul.f32 %v2123_v23, %v1221_v46 }
 0x18a   : > { %v1274_v17 = vadd.f32 %v2128_v35, %v1254_v61 }
 0x18b   : > { %v1269_v31 = vadd.f32 %v2128_v35, %v1249_v24 }
 0x18c   : > { %vm1291_vm6 = vcmp.gt.f32.partialorder %v1274_v17, 0.0  ;;  %v1308_v49 = vmul.f32 %v2132_v10, %v1274_v17  ;;  %v1173_v47 = vpop.f32.mrf.mxu1 }
 0x18d   : > { %vm1286_vm7 = vcmp.gt.f32.partialorder %v1269_v31, 0.0  ;;  %v1303_v28 = vmul.f32 %v2132_v10, %v1269_v31  ;;  %v1174_v32 = vadd.f32 %v1173_v47, %v1124_v14 }
 0x18e   : > { %v1324_v51 = vsel %vm1291_vm6, %v1274_v17, %v1308_v49 }
 0x18f   : > { %v1319_v42 = vsel %vm1286_vm7, %v1269_v31, %v1303_v28  ;;  %1340 = vst [vmem:[%s2138_s28 + $0x78] sm:$0xff] %v1324_v51  ;;  %v1223_v6 = vadd.f32 %v2168_v62, %v1174_v32 }
 0x190   : > { %1335 = vst [vmem:[%s2138_s28 + $0x50] sm:$0xff] %v1319_v42 }
 0x191   : > { %v1250_v8 = vmul.f32 %v2123_v23, %v1223_v6 }
 0x193   : > { %v1270_v33 = vadd.f32 %v2128_v35, %v1250_v8 }
 0x195   : > { %vm1287_vm8 = vcmp.gt.f32.partialorder %v1270_v33, 0.0  ;;  %v1304_v34 = vmul.f32 %v2132_v10, %v1270_v33 }
 0x197   : > { %v1320_v36 = vsel %vm1287_vm8, %v1270_v33, %v1304_v34 }
 0x198   : > { %1336 = vst [vmem:[%s2138_s28 + $0x58] sm:$0xff] %v1320_v36 }
 0x199 PF: > { %s16_s20 = sadd.s32 1, %s1601_s20  }
 0x19a   : > { %p13_p4 = scmp.ge.s32.totalorder %s16_s20, 6  }
 0x19c   :  { %15 = sbr.rel (!%p13_p4) target bundleno = 2 (0x2), region = 70 }

</bundles_post_ra>
